<compile_context>
chip_gen: v6e
topology: v6e:2x2x1
jax: 0.10.0
libtpu: 0.0.40
codegen_flags: <defaults>
</compile_context>

<pallas_src>
import jax
import jax.numpy as jnp
from jax.experimental import pallas as pl
from jax.experimental.pallas import tpu as pltpu


KPAD = 128      # padded im2col contraction depth (KH*KW*Cin = 90 -> 128)
COUT_PAD = 128  # padded output channels (100 -> 128) => lane-dense output


def conv_relu_kernel(lhs_ref, w_ref, b_ref, o_ref):
    # lhs_ref: (OH*OW, KPAD)      im2col patches for one image (lane-dense)
    # w_ref:   (KPAD, COUT_PAD)   im2col-reshaped, zero-padded weights
    # b_ref:   (1, COUT_PAD)      zero-padded bias
    # o_ref:   (OH*OW, COUT_PAD)  lane-dense output slab for one image
    acc = jnp.dot(lhs_ref[...], w_ref[...], preferred_element_type=jnp.float32)
    acc = jnp.maximum(acc + b_ref[...], 0.0)
    o_ref[...] = acc.astype(o_ref.dtype)


def conv2d_relu(x_nchw, w_oihw, bias):
    """Equivalent of nn.Sequential(nn.Conv2d(Cin, Cout, K), nn.ReLU()) on NCHW input."""
    N, Cin, H, W = x_nchw.shape
    Cout, _, KH, KW = w_oihw.shape
    OH = H - KH + 1
    OW = W - KW + 1
    Kdim = KH * KW * Cin
    M = OH * OW
    assert Kdim <= KPAD and Cout <= COUT_PAD

    # ---- layout plumbing in the wrapper (fused / constant-folded by XLA) ----
    # im2col LHS: (N, OH*OW, KPAD); tap order (kh, kw, cin) matches the weight
    # reshape order below.
    x_nhwc = jnp.transpose(x_nchw, (0, 2, 3, 1))                       # (N,H,W,Cin)
    taps = [x_nhwc[:, kh:kh + OH, kw:kw + OW, :]
            for kh in range(KH) for kw in range(KW)]
    lhs = jnp.concatenate(taps, axis=-1).reshape(N, M, Kdim)           # (N,196,90)
    lhs = jnp.pad(lhs, ((0, 0), (0, 0), (0, KPAD - Kdim)))             # (N,196,128)

    # Weights (KH,KW,Cin,Cout) flattened + zero-padded to (128,128); bias (1,128).
    w_2d = jnp.transpose(w_oihw, (2, 3, 1, 0)).reshape(Kdim, Cout)     # (90,100)
    w_2d = jnp.pad(w_2d, ((0, KPAD - Kdim), (0, COUT_PAD - Cout)))     # (128,128)
    b2 = jnp.pad(bias, (0, COUT_PAD - Cout)).reshape(1, COUT_PAD)      # (1,128)

    itemsize = jnp.dtype(x_nchw.dtype).itemsize
    cost = pl.CostEstimate(
        flops=2 * N * M * KPAD * COUT_PAD,
        transcendentals=0,
        bytes_accessed=(lhs.size + w_2d.size + b2.size + N * M * COUT_PAD)
        * itemsize,
    )

    out3d = pl.pallas_call(
        conv_relu_kernel,
        out_shape=jax.ShapeDtypeStruct((N, M, COUT_PAD), x_nchw.dtype),
        grid=(N,),
        in_specs=[
            pl.BlockSpec((None, M, KPAD), lambda b: (b, 0, 0)),
            pl.BlockSpec((KPAD, COUT_PAD), lambda b: (0, 0)),
            pl.BlockSpec((1, COUT_PAD), lambda b: (0, 0)),
        ],
        out_specs=pl.BlockSpec((None, M, COUT_PAD), lambda b: (b, 0, 0)),
        compiler_params=pltpu.CompilerParams(
            dimension_semantics=("parallel",)),
        cost_estimate=cost,
    )(lhs, w_2d, b2)

    # Drop the padded channels and restore NCHW semantics.
    out = out3d[:, :, :Cout].reshape(N, OH, OW, Cout)
    return jnp.transpose(out, (0, 3, 1, 2))                            # (N,Cout,OH,OW)


if __name__ == "__main__":
    key = jax.random.PRNGKey(0)
    kx, kw, kb = jax.random.split(key, 3)

    N, Cin, H, W = 2, 10, 16, 16     # Cin fixed to 10 by the module
    Cout, K = 100, 3                 # Conv2d(10, 100, 3)

    x = jax.random.normal(kx, (N, Cin, H, W), dtype=jnp.float32)
    # Deterministic synthetic parameters (shapes match nn.Conv2d(10,100,3)).
    fan_in = Cin * K * K
    bound = 1.0 / (fan_in ** 0.5)
    w = jax.random.uniform(kw, (Cout, Cin, K, K), jnp.float32, -bound, bound)
    b = jax.random.uniform(kb, (Cout,), jnp.float32, -bound, bound)

    run = jax.jit(conv2d_relu)
    out = run(x, w, b)
    out = jax.block_until_ready(out)

    # Reference check against XLA conv (same math, f32).
    ref = jax.lax.conv_general_dilated(
        x, w, window_strides=(1, 1), padding="VALID",
        dimension_numbers=("NCHW", "OIHW", "NCHW"))
    ref = jnp.maximum(ref + b[None, :, None, None], 0.0)
    assert out.shape == (N, Cout, H - K + 1, W - K + 1)
    assert jnp.allclose(out, ref, rtol=1e-3, atol=1e-3)

    print("KERNEL_OK")
</pallas_src>

<mosaic_0001>
module attributes {stable_mosaic.version = 11 : i64} {
  func.func @conv_relu_kernel(%arg0: i32, %arg1: memref<1x196x128xf32, #tpu.memory_space<vmem>>, %arg2: memref<128x128xf32, #tpu.memory_space<vmem>>, %arg3: memref<1x128xf32, #tpu.memory_space<vmem>>, %arg4: memref<1x196x128xf32, #tpu.memory_space<vmem>>) attributes {dimension_semantics = [#tpu.dimension_semantics<parallel>], iteration_bounds = array<i64: 2>, scalar_prefetch = 0 : i64, scratch_operands = 0 : i64, tpu.core_type = #tpu.core_type<tc>, window_params = [{transform_indices = @transform_0, window_bounds = array<i64: 1, 196, 128>}, {pipeline_mode = #tpu.pipeline_mode<synchronous>, transform_indices = @transform_1, window_bounds = array<i64: 128, 128>}, {pipeline_mode = #tpu.pipeline_mode<synchronous>, transform_indices = @transform_2, window_bounds = array<i64: 1, 128>}, {transform_indices = @transform_3, window_bounds = array<i64: 1, 196, 128>}]} {
    %c0 = arith.constant 0 : index
    %c0_0 = arith.constant 0 : index
    %c0_1 = arith.constant 0 : index
    %0 = vector.load %arg1[%c0, %c0_0, %c0_1] : memref<1x196x128xf32, #tpu.memory_space<vmem>>, vector<1x196x128xf32>
    %1 = vector.shape_cast %0 : vector<1x196x128xf32> to vector<196x128xf32>
    %c0_2 = arith.constant 0 : index
    %c0_3 = arith.constant 0 : index
    %2 = vector.load %arg2[%c0_2, %c0_3] : memref<128x128xf32, #tpu.memory_space<vmem>>, vector<128x128xf32>
    %cst = arith.constant dense<0.000000e+00> : vector<196x128xf32>
    %3 = tpu.matmul %1, %2, %cst {dimension_numbers = #tpu.dot_dimension_numbers<[1], [0], [0], [1], [0, 0, 1, 1], [], []>} : vector<196x128xf32>, vector<128x128xf32>, vector<196x128xf32> -> vector<196x128xf32>
    %c0_4 = arith.constant 0 : index
    %c0_5 = arith.constant 0 : index
    %4 = vector.load %arg3[%c0_4, %c0_5] : memref<1x128xf32, #tpu.memory_space<vmem>>, vector<1x128xf32>
    %5 = vector.broadcast %4 : vector<1x128xf32> to vector<196x128xf32>
    %6 = arith.addf %3, %5 : vector<196x128xf32>
    %cst_6 = arith.constant 0.000000e+00 : f32
    %7 = vector.broadcast %cst_6 : f32 to vector<196x128xf32>
    %8 = arith.maximumf %6, %7 : vector<196x128xf32>
    %c0_7 = arith.constant 0 : index
    %c0_8 = arith.constant 0 : index
    %c0_9 = arith.constant 0 : index
    %9 = vector.load %arg4[%c0_7, %c0_8, %c0_9] : memref<1x196x128xf32, #tpu.memory_space<vmem>>, vector<1x196x128xf32>
    %10 = vector.shape_cast %9 : vector<1x196x128xf32> to vector<196x128xf32>
    %11 = vector.shape_cast %8 : vector<196x128xf32> to vector<1x196x128xf32>
    tpu.vector_store %arg4[%c0_7, %c0_8, %c0_9], %11 {strides = array<i32>} : memref<1x196x128xf32, #tpu.memory_space<vmem>>, vector<1x196x128xf32>,
    return
  }
  func.func @transform_0(%arg0: i32) -> (i32, i32, i32) {
    %c0_i32 = arith.constant 0 : i32
    %c0_i32_0 = arith.constant 0 : i32
    %c0_i32_1 = arith.constant 0 : i32
    return %arg0, %c0_i32, %c0_i32_0 : i32, i32, i32
  }
  func.func @transform_1(%arg0: i32) -> (i32, i32) {
    %c0_i32 = arith.constant 0 : i32
    %c0_i32_0 = arith.constant 0 : i32
    %c0_i32_1 = arith.constant 0 : i32
    return %c0_i32, %c0_i32_0 : i32, i32
  }
  func.func @transform_2(%arg0: i32) -> (i32, i32) {
    %c0_i32 = arith.constant 0 : i32
    %c0_i32_0 = arith.constant 0 : i32
    %c0_i32_1 = arith.constant 0 : i32
    return %c0_i32, %c0_i32_0 : i32, i32
  }
  func.func @transform_3(%arg0: i32) -> (i32, i32, i32) {
    %c0_i32 = arith.constant 0 : i32
    %c0_i32_0 = arith.constant 0 : i32
    %c0_i32_1 = arith.constant 0 : i32
    return %arg0, %c0_i32, %c0_i32_0 : i32, i32, i32
  }
}

</mosaic_0001>

<bundles_post_ra>
// kernel: conv2d_relu.1
= control target key start
LH: loop header
LB: loop body
LE: loop exit
PB: predicated region body
PF: predicated region fallthrough
CT: control target
= control target key end

     0   :  { %s745_s12 = smov 0   ;;  %s987_s0 = inlined_call_operand.vmem [shape: f32[2,196,128], index: 0, kind: input, shape index: {}]   ;;  %s988_s1 = inlined_call_operand.vmem [shape: f32[128,128], index: 1, kind: input, shape index: {}]   ;;  %s989_s2 = inlined_call_operand.vmem [shape: f32[1,128], index: 2, kind: input, shape index: {}]   ;;  %s990_s3 = inlined_call_operand.vmem [shape: f32[2,196,128], index: 3, kind: output, shape index: {}]  }
   0x1 LB: > { %s514_s13 = sadd.s32 4294967295, %s721_s12   ;;  %p518_p0 = scmp.ge.s32.totalorder %s721_s12, 1  ;;  %s721_s12 = sphi %s745_s12, %s13_s12  }
   0x2   : > { %p137_p1 = scmp.lt.s32.totalorder %s721_s12, 3 }
   0x4   : > { %p138_p2 = pnand %p518_p0, %p137_p1 }
   0x5   : > { %p161_p3 = scmp.lt.s32.totalorder (!%p138_p2), %s514_s13, 1 }
   0x6   : > { %141 = sbr.rel (%p138_p2) target bundleno = 290 (0x122), region = 32 }
   0xb   : > { %v211_v0 = vld [vmem:[%s988_s1 + $0x78] sm:$0xff]  ;;  %v723_v1 = vmov 0.0   ;;  %v210_v2 = vld [vmem:[%s988_s1 + $0x70] sm:$0xff]  ;;  %v209_v3 = vld [vmem:[%s988_s1 + $0x68] sm:$0xff]  ;;  %s992_s13 = smov (!%p161_p3, %s514_s13), 1  ;;  %vm724_vm0 = vmmov 0  }
   0xc   : > { %565 = vmatprep.subr.mxu0 %v723_v1  ;;  %672 = vmatprep.subr.mxu1 %v723_v1  ;;  %v208_v4 = vld [vmem:[%s988_s1 + $0x60] sm:$0xff]  ;;  %v207_v5 = vld [vmem:[%s988_s1 + $0x58] sm:$0xff]  ;;  %v206_v6 = vld [vmem:[%s988_s1 + $0x50] sm:$0xff]  ;;  %s704_s15 = smul.u32 200, %s992_s13 }
   0xd   : > { %566 = vmatpush3.msra.mxu0 %v211_v0  ;;  %688 = vmatpush3.msra.mxu1 %v211_v0  ;;  %v205_v7 = vld [vmem:[%s988_s1 + $0x48] sm:$0xff]  ;;  %v204_v8 = vld [vmem:[%s988_s1 + $0x40] sm:$0xff]  ;;  %v203_v9 = vld [vmem:[%s988_s1 + $0x38] sm:$0xff] }
   0xe   : > { %567 = vmatprep.subr.mxu0 %v723_v1  ;;  %673 = vmatprep.subr.mxu1 %v723_v1  ;;  %v202_v10 = vld [vmem:[%s988_s1 + $0x30] sm:$0xff]  ;;  %v201_v11 = vld [vmem:[%s988_s1 + $0x28] sm:$0xff]  ;;  %v200_v12 = vld [vmem:[%s988_s1 + $0x20] sm:$0xff]  ;;  %s838_s22 = scalar_lea.vmem %s987_s0, %s704_s15  ;;  %s933_s29 = scalar_lea.vmem %s990_s3, %s704_s15 }
   0xf   : > { %568 = vmatpush3.msra.mxu0 %v210_v2  ;;  %689 = vmatpush3.msra.mxu1 %v210_v2  ;;  %v199_v13 = vld [vmem:[%s988_s1 + $0x18] sm:$0xff]  ;;  %v198_v14 = vld [vmem:[%s988_s1 + $0x10] sm:$0xff]  ;;  %v197_v15 = vld [vmem:[%s988_s1 + $0x8] sm:$0xff] }
  0x10   : > { %569 = vmatprep.subr.mxu0 %v723_v1  ;;  %674 = vmatprep.subr.mxu1 %v723_v1  ;;  %v196_v16 = vld [vmem:[%s988_s1] sm:$0xff]  ;;  %v184_v18 = vld [vmem:[%s838_s22 + $0x68] sm:$0xff]  ;;  %v185_v20 = vld [vmem:[%s838_s22 + $0x70] sm:$0xff] }
  0x11   : > { %570 = vmatpush3.msra.mxu0 %v209_v3  ;;  %690 = vmatpush3.msra.mxu1 %v209_v3  ;;  %v171_v17 = vld [vmem:[%s838_s22] sm:$0xff]  ;;  %v172_v19 = vld [vmem:[%s838_s22 + $0x8] sm:$0xff]  ;;  %v173_v21 = vld [vmem:[%s838_s22 + $0x10] sm:$0xff] }
  0x12   : > { %571 = vmatprep.subr.mxu0 %v723_v1  ;;  %675 = vmatprep.subr.mxu1 %v723_v1  ;;  %v186_v22 = vld [vmem:[%s838_s22 + $0x78] sm:$0xff]  ;;  %v187_v24 = vld [vmem:[%s838_s22 + $0x80] sm:$0xff]  ;;  %v188_v26 = vld [vmem:[%s838_s22 + $0x88] sm:$0xff] }
  0x13   : > { %572 = vmatpush3.msra.mxu0 %v208_v4  ;;  %691 = vmatpush3.msra.mxu1 %v208_v4  ;;  %v174_v23 = vld [vmem:[%s838_s22 + $0x18] sm:$0xff]  ;;  %v175_v25 = vld [vmem:[%s838_s22 + $0x20] sm:$0xff]  ;;  %v176_v27 = vld [vmem:[%s838_s22 + $0x28] sm:$0xff] }
  0x14   : > { %573 = vmatprep.subr.mxu0 %v723_v1  ;;  %676 = vmatprep.subr.mxu1 %v723_v1  ;;  %v189_v28 = vld [vmem:[%s838_s22 + $0x90] sm:$0xff]  ;;  %v190_v30 = vld [vmem:[%s838_s22 + $0x98] sm:$0xff]  ;;  %v191_v32 = vld [vmem:[%s838_s22 + $0xa0] sm:$0xff] }
  0x15   : > { %574 = vmatpush3.msra.mxu0 %v207_v5  ;;  %692 = vmatpush3.msra.mxu1 %v207_v5  ;;  %v177_v29 = vld [vmem:[%s838_s22 + $0x30] sm:$0xff]  ;;  %v178_v31 = vld [vmem:[%s838_s22 + $0x38] sm:$0xff]  ;;  %v179_v33 = vld [vmem:[%s838_s22 + $0x40] sm:$0xff] }
  0x16   : > { %575 = vmatprep.subr.mxu0 %v723_v1  ;;  %677 = vmatprep.subr.mxu1 %v723_v1  ;;  %v192_v34 = vld [vmem:[%s838_s22 + $0xa8] sm:$0xff]  ;;  %v193_v36 = vld [vmem:[%s838_s22 + $0xb0] sm:$0xff]  ;;  %v194_v38 = vld [vmem:[%s838_s22 + $0xb8] sm:$0xff] }
  0x17   : > { %576 = vmatpush3.msra.mxu0 %v206_v6  ;;  %693 = vmatpush3.msra.mxu1 %v206_v6  ;;  %v180_v35 = vld [vmem:[%s838_s22 + $0x48] sm:$0xff]  ;;  %v181_v37 = vld [vmem:[%s838_s22 + $0x50] sm:$0xff]  ;;  %v182_v39 = vld [vmem:[%s838_s22 + $0x58] sm:$0xff] }
  0x18   : > { %577 = vmatprep.subr.mxu0 %v723_v1  ;;  %678 = vmatprep.subr.mxu1 %v723_v1  ;;  %v195_v40 = vld [vmem:[%s838_s22 + $0xc0] sm:$0xf] }
  0x19   : > { %578 = vmatpush3.msra.mxu0 %v205_v7  ;;  %694 = vmatpush3.msra.mxu1 %v205_v7  ;;  %v183_v41 = vld [vmem:[%s838_s22 + $0x60] sm:$0xff] }
  0x1a   : > { %579 = vmatprep.subr.mxu0 %v723_v1  ;;  %679 = vmatprep.subr.mxu1 %v723_v1  ;;  %v925_v42 = vld [vmem:[%s989_s2] ss:$0 sm:$0xff] }
  0x1b   : > { %580 = vmatpush3.msra.mxu0 %v204_v8  ;;  %695 = vmatpush3.msra.mxu1 %v204_v8 }
  0x1c   : > { %581 = vmatprep.subr.mxu0 %v723_v1  ;;  %680 = vmatprep.subr.mxu1 %v723_v1 }
  0x1d   : > { %582 = vmatpush3.msra.mxu0 %v203_v9  ;;  %696 = vmatpush3.msra.mxu1 %v203_v9 }
  0x1e   : > { %583 = vmatprep.subr.mxu0 %v723_v1  ;;  %681 = vmatprep.subr.mxu1 %v723_v1 }
  0x1f   : > { %584 = vmatpush3.msra.mxu0 %v202_v10  ;;  %697 = vmatpush3.msra.mxu1 %v202_v10 }
  0x20   : > { %585 = vmatprep.subr.mxu0 %v723_v1  ;;  %682 = vmatprep.subr.mxu1 %v723_v1 }
  0x21   : > { %586 = vmatpush3.msra.mxu0 %v201_v11  ;;  %698 = vmatpush3.msra.mxu1 %v201_v11 }
  0x22   : > { %587 = vmatprep.subr.mxu0 %v723_v1  ;;  %683 = vmatprep.subr.mxu1 %v723_v1 }
  0x23   : > { %588 = vmatpush3.msra.mxu0 %v200_v12  ;;  %699 = vmatpush3.msra.mxu1 %v200_v12 }
  0x24   : > { %589 = vmatprep.subr.mxu0 %v723_v1  ;;  %684 = vmatprep.subr.mxu1 %v723_v1 }
  0x25   : > { %590 = vmatpush3.msra.mxu0 %v199_v13  ;;  %700 = vmatpush3.msra.mxu1 %v199_v13 }
  0x26   : > { %591 = vmatprep.subr.mxu0 %v723_v1  ;;  %685 = vmatprep.subr.mxu1 %v723_v1 }
  0x27   : > { %592 = vmatpush3.msra.mxu0 %v198_v14  ;;  %701 = vmatpush3.msra.mxu1 %v198_v14 }
  0x28   : > { %593 = vmatprep.subr.mxu0 %v723_v1  ;;  %686 = vmatprep.subr.mxu1 %v723_v1 }
  0x29   : > { %594 = vmatpush3.msra.mxu0 %v197_v15  ;;  %702 = vmatpush3.msra.mxu1 %v197_v15 }
  0x2a   : > { %595 = vmatprep.subr.mxu0 %v723_v1  ;;  %597 = vmatprep.mubr.msk.f32.mxu0 %vm724_vm0, %v723_v1 }
  0x2b   : > { %596 = vmatpush3.msra.mxu0 %v196_v16  ;;  %687 = vmatprep.subr.mxu1 %v723_v1 }
  0x2c   : > { %598 = vmatmul.mubr.f32.vlgmr.msra.gmra.mxu0 %v171_v17  ;;  %703 = vmatpush3.msra.mxu1 %v196_v16 }
  0x2d   : > { %636 = vmatprep.mubr.msk.f32.mxu1 %vm724_vm0, %v723_v1  ;;  %600 = vmatprep.mubr.msk.f32.mxu0 %vm724_vm0, %v723_v1 }
  0x2e   : > { %637 = vmatmul.mubr.f32.vlgmr.msra.gmra.mxu1 %v184_v18 }
  0x2f   : > { %639 = vmatprep.mubr.msk.f32.mxu1 %vm724_vm0, %v723_v1 }
  0x30   : > { %601 = vmatmul.mubr.f32.gmra.mxu0 %v172_v19 }
  0x31   : > { %603 = vmatprep.mubr.msk.f32.mxu0 %vm724_vm0, %v723_v1 }
  0x32   : > { %640 = vmatmul.mubr.f32.gmra.mxu1 %v185_v20 }
  0x33   : > { %642 = vmatprep.mubr.msk.f32.mxu1 %vm724_vm0, %v723_v1 }
  0x34   : > { %604 = vmatmul.mubr.f32.gmra.mxu0 %v173_v21 }
  0x35   : > { %606 = vmatprep.mubr.msk.f32.mxu0 %vm724_vm0, %v723_v1 }
  0x36   : > { %643 = vmatmul.mubr.f32.gmra.mxu1 %v186_v22 }
  0x37   : > { %645 = vmatprep.mubr.msk.f32.mxu1 %vm724_vm0, %v723_v1 }
  0x38   : > { %607 = vmatmul.mubr.f32.gmra.mxu0 %v174_v23 }
  0x39   : > { %609 = vmatprep.mubr.msk.f32.mxu0 %vm724_vm0, %v723_v1 }
  0x3a   : > { %646 = vmatmul.mubr.f32.gmra.mxu1 %v187_v24 }
  0x3b   : > { %648 = vmatprep.mubr.msk.f32.mxu1 %vm724_vm0, %v723_v1 }
  0x3c   : > { %610 = vmatmul.mubr.f32.gmra.mxu0 %v175_v25 }
  0x3d   : > { %612 = vmatprep.mubr.msk.f32.mxu0 %vm724_vm0, %v723_v1 }
  0x3e   : > { %649 = vmatmul.mubr.f32.gmra.mxu1 %v188_v26 }
  0x3f   : > { %651 = vmatprep.mubr.msk.f32.mxu1 %vm724_vm0, %v723_v1 }
  0x40   : > { %613 = vmatmul.mubr.f32.gmra.mxu0 %v176_v27 }
  0x41   : > { %615 = vmatprep.mubr.msk.f32.mxu0 %vm724_vm0, %v723_v1 }
  0x42   : > { %652 = vmatmul.mubr.f32.gmra.mxu1 %v189_v28 }
  0x43   : > { %654 = vmatprep.mubr.msk.f32.mxu1 %vm724_vm0, %v723_v1 }
  0x44   : > { %616 = vmatmul.mubr.f32.gmra.mxu0 %v177_v29 }
  0x45   : > { %618 = vmatprep.mubr.msk.f32.mxu0 %vm724_vm0, %v723_v1 }
  0x46   : > { %655 = vmatmul.mubr.f32.gmra.mxu1 %v190_v30 }
  0x47   : > { %657 = vmatprep.mubr.msk.f32.mxu1 %vm724_vm0, %v723_v1 }
  0x48   : > { %619 = vmatmul.mubr.f32.gmra.mxu0 %v178_v31 }
  0x49   : > { %621 = vmatprep.mubr.msk.f32.mxu0 %vm724_vm0, %v723_v1 }
  0x4a   : > { %658 = vmatmul.mubr.f32.gmra.mxu1 %v191_v32 }
  0x4b   : > { %660 = vmatprep.mubr.msk.f32.mxu1 %vm724_vm0, %v723_v1 }
  0x4c   : > { %622 = vmatmul.mubr.f32.gmra.mxu0 %v179_v33 }
  0x4d   : > { %624 = vmatprep.mubr.msk.f32.mxu0 %vm724_vm0, %v723_v1 }
  0x4e   : > { %661 = vmatmul.mubr.f32.gmra.mxu1 %v192_v34 }
  0x4f   : > { %663 = vmatprep.mubr.msk.f32.mxu1 %vm724_vm0, %v723_v1 }
  0x50   : > { %625 = vmatmul.mubr.f32.gmra.mxu0 %v180_v35 }
  0x51   : > { %627 = vmatprep.mubr.msk.f32.mxu0 %vm724_vm0, %v723_v1 }
  0x52   : > { %664 = vmatmul.mubr.f32.gmra.mxu1 %v193_v36 }
  0x53   : > { %666 = vmatprep.mubr.msk.f32.mxu1 %vm724_vm0, %v723_v1 }
  0x54   : > { %628 = vmatmul.mubr.f32.gmra.mxu0 %v181_v37 }
  0x55   : > { %630 = vmatprep.mubr.msk.f32.mxu0 %vm724_vm0, %v723_v1 }
  0x56   : > { %667 = vmatmul.mubr.f32.gmra.mxu1 %v194_v38 }
  0x57   : > { %669 = vmatprep.mubr.msk.f32.mxu1 %vm724_vm0, %v723_v1 }
  0x58   : > { %631 = vmatmul.mubr.f32.gmra.mxu0 %v182_v39 }
  0x59   : > { %633 = vmatprep.mubr.msk.f32.mxu0 %vm724_vm0, %v723_v1 }
  0x5a   : > { %670 = vmatmul.mubr.f32.gmra.mxu1 %v195_v40 }
  0x5c   : > { %634 = vmatmul.mubr.f32.gmra.mxu0 %v183_v41 }
  0xec   : > { %v285_v43 = vpop.f32.mrf.mxu0 }
  0xed   : > { %v286_v44 = vadd.f32 %v925_v42, %v285_v43 }
  0xee   : > { %v599_v45 = vpop.f32.mrf.mxu0  ;;  %v350_v46 = vpop.f32.mrf.mxu1 }
  0xef   : > { %v409_v47 = vmax.f32 %v286_v44, 0.0  ;;  %v351_v48 = vadd.f32 %v925_v42, %v350_v46 }
  0xf0   : > { %v290_v49 = vpop.f32.mrf.mxu0  ;;  %v638_v50 = vpop.f32.mrf.mxu1 }
  0xf1   : > { %434 = vst [vmem:[%s933_s29] sm:$0xff] %v409_v47  ;;  %v422_v51 = vmax.f32 %v351_v48, 0.0  ;;  %v291_v52 = vadd.f32 %v925_v42, %v290_v49 }
  0xf2   : > { %v602_v53 = vpop.f32.mrf.mxu0  ;;  %v355_v54 = vpop.f32.mrf.mxu1 }
  0xf3   : > { %447 = vst [vmem:[%s933_s29 + $0x68] sm:$0xff] %v422_v51  ;;  %v410_v55 = vmax.f32 %v291_v52, 0.0  ;;  %v356_v56 = vadd.f32 %v925_v42, %v355_v54 }
  0xf4   : > { %v295_v57 = vpop.f32.mrf.mxu0  ;;  %v641_v58 = vpop.f32.mrf.mxu1 }
  0xf5   : > { %435 = vst [vmem:[%s933_s29 + $0x8] sm:$0xff] %v410_v55  ;;  %v423_v59 = vmax.f32 %v356_v56, 0.0  ;;  %v296_v60 = vadd.f32 %v925_v42, %v295_v57 }
  0xf6   : > { %v605_v61 = vpop.f32.mrf.mxu0  ;;  %v360_v62 = vpop.f32.mrf.mxu1 }
  0xf7   : > { %448 = vst [vmem:[%s933_s29 + $0x70] sm:$0xff] %v423_v59  ;;  %v411_v63 = vmax.f32 %v296_v60, 0.0  ;;  %v361_v0 = vadd.f32 %v925_v42, %v360_v62 }
  0xf8   : > { %v300_v1 = vpop.f32.mrf.mxu0  ;;  %v644_v2 = vpop.f32.mrf.mxu1 }
  0xf9   : > { %436 = vst [vmem:[%s933_s29 + $0x10] sm:$0xff] %v411_v63  ;;  %v424_v3 = vmax.f32 %v361_v0, 0.0  ;;  %v301_v4 = vadd.f32 %v925_v42, %v300_v1 }
  0xfa   : > { %v608_v5 = vpop.f32.mrf.mxu0  ;;  %v365_v6 = vpop.f32.mrf.mxu1 }
  0xfb   : > { %449 = vst [vmem:[%s933_s29 + $0x78] sm:$0xff] %v424_v3  ;;  %v412_v7 = vmax.f32 %v301_v4, 0.0  ;;  %v366_v8 = vadd.f32 %v925_v42, %v365_v6 }
  0xfc   : > { %v305_v9 = vpop.f32.mrf.mxu0  ;;  %v647_v10 = vpop.f32.mrf.mxu1 }
  0xfd   : > { %437 = vst [vmem:[%s933_s29 + $0x18] sm:$0xff] %v412_v7  ;;  %v425_v11 = vmax.f32 %v366_v8, 0.0  ;;  %v306_v12 = vadd.f32 %v925_v42, %v305_v9 }
  0xfe   : > { %v611_v13 = vpop.f32.mrf.mxu0  ;;  %v370_v14 = vpop.f32.mrf.mxu1 }
  0xff   : > { %450 = vst [vmem:[%s933_s29 + $0x80] sm:$0xff] %v425_v11  ;;  %v413_v15 = vmax.f32 %v306_v12, 0.0  ;;  %v371_v16 = vadd.f32 %v925_v42, %v370_v14 }
 0x100   : > { %v310_v17 = vpop.f32.mrf.mxu0  ;;  %v650_v18 = vpop.f32.mrf.mxu1 }
 0x101   : > { %438 = vst [vmem:[%s933_s29 + $0x20] sm:$0xff] %v413_v15  ;;  %v426_v19 = vmax.f32 %v371_v16, 0.0  ;;  %v311_v20 = vadd.f32 %v925_v42, %v310_v17 }
 0x102   : > { %v614_v21 = vpop.f32.mrf.mxu0  ;;  %v375_v22 = vpop.f32.mrf.mxu1 }
 0x103   : > { %451 = vst [vmem:[%s933_s29 + $0x88] sm:$0xff] %v426_v19  ;;  %v414_v23 = vmax.f32 %v311_v20, 0.0  ;;  %v376_v24 = vadd.f32 %v925_v42, %v375_v22 }
 0x104   : > { %v315_v25 = vpop.f32.mrf.mxu0  ;;  %v653_v26 = vpop.f32.mrf.mxu1 }
 0x105   : > { %439 = vst [vmem:[%s933_s29 + $0x28] sm:$0xff] %v414_v23  ;;  %v427_v27 = vmax.f32 %v376_v24, 0.0  ;;  %v316_v28 = vadd.f32 %v925_v42, %v315_v25 }
 0x106   : > { %v617_v29 = vpop.f32.mrf.mxu0  ;;  %v380_v30 = vpop.f32.mrf.mxu1 }
 0x107   : > { %452 = vst [vmem:[%s933_s29 + $0x90] sm:$0xff] %v427_v27  ;;  %v415_v31 = vmax.f32 %v316_v28, 0.0  ;;  %v381_v32 = vadd.f32 %v925_v42, %v380_v30 }
 0x108   : > { %v320_v33 = vpop.f32.mrf.mxu0  ;;  %v656_v34 = vpop.f32.mrf.mxu1 }
 0x109   : > { %440 = vst [vmem:[%s933_s29 + $0x30] sm:$0xff] %v415_v31  ;;  %v428_v35 = vmax.f32 %v381_v32, 0.0  ;;  %v321_v36 = vadd.f32 %v925_v42, %v320_v33 }
 0x10a   : > { %v620_v37 = vpop.f32.mrf.mxu0  ;;  %v385_v38 = vpop.f32.mrf.mxu1 }
 0x10b   : > { %453 = vst [vmem:[%s933_s29 + $0x98] sm:$0xff] %v428_v35  ;;  %v416_v39 = vmax.f32 %v321_v36, 0.0  ;;  %v386_v40 = vadd.f32 %v925_v42, %v385_v38 }
 0x10c   : > { %v325_v41 = vpop.f32.mrf.mxu0  ;;  %v659_v43 = vpop.f32.mrf.mxu1 }
 0x10d   : > { %441 = vst [vmem:[%s933_s29 + $0x38] sm:$0xff] %v416_v39  ;;  %v429_v44 = vmax.f32 %v386_v40, 0.0  ;;  %v326_v45 = vadd.f32 %v925_v42, %v325_v41 }
 0x10e   : > { %v623_v46 = vpop.f32.mrf.mxu0  ;;  %v390_v47 = vpop.f32.mrf.mxu1 }
 0x10f   : > { %454 = vst [vmem:[%s933_s29 + $0xa0] sm:$0xff] %v429_v44  ;;  %v417_v48 = vmax.f32 %v326_v45, 0.0  ;;  %v391_v49 = vadd.f32 %v925_v42, %v390_v47 }
 0x110   : > { %v330_v50 = vpop.f32.mrf.mxu0  ;;  %v662_v51 = vpop.f32.mrf.mxu1 }
 0x111   : > { %442 = vst [vmem:[%s933_s29 + $0x40] sm:$0xff] %v417_v48  ;;  %v430_v52 = vmax.f32 %v391_v49, 0.0  ;;  %v331_v53 = vadd.f32 %v925_v42, %v330_v50 }
 0x112   : > { %v626_v54 = vpop.f32.mrf.mxu0  ;;  %v395_v55 = vpop.f32.mrf.mxu1 }
 0x113   : > { %455 = vst [vmem:[%s933_s29 + $0xa8] sm:$0xff] %v430_v52  ;;  %v418_v56 = vmax.f32 %v331_v53, 0.0  ;;  %v396_v57 = vadd.f32 %v925_v42, %v395_v55 }
 0x114   : > { %v335_v58 = vpop.f32.mrf.mxu0  ;;  %v665_v59 = vpop.f32.mrf.mxu1 }
 0x115   : > { %443 = vst [vmem:[%s933_s29 + $0x48] sm:$0xff] %v418_v56  ;;  %v431_v60 = vmax.f32 %v396_v57, 0.0  ;;  %v336_v61 = vadd.f32 %v925_v42, %v335_v58 }
 0x116   : > { %v629_v62 = vpop.f32.mrf.mxu0  ;;  %v400_v63 = vpop.f32.mrf.mxu1 }
 0x117   : > { %456 = vst [vmem:[%s933_s29 + $0xb0] sm:$0xff] %v431_v60  ;;  %v419_v0 = vmax.f32 %v336_v61, 0.0  ;;  %v401_v1 = vadd.f32 %v925_v42, %v400_v63 }
 0x118   : > { %v340_v2 = vpop.f32.mrf.mxu0  ;;  %v668_v3 = vpop.f32.mrf.mxu1 }
 0x119   : > { %444 = vst [vmem:[%s933_s29 + $0x50] sm:$0xff] %v419_v0  ;;  %v432_v4 = vmax.f32 %v401_v1, 0.0  ;;  %v341_v5 = vadd.f32 %v925_v42, %v340_v2 }
 0x11a   : > { %v632_v6 = vpop.f32.mrf.mxu0  ;;  %v405_v7 = vpop.f32.mrf.mxu1 }
 0x11b   : > { %457 = vst [vmem:[%s933_s29 + $0xb8] sm:$0xff] %v432_v4  ;;  %v420_v8 = vmax.f32 %v341_v5, 0.0  ;;  %v406_v9 = vadd.f32 %v925_v42, %v405_v7 }
 0x11c   : > { %v345_v10 = vpop.f32.mrf.mxu0  ;;  %v671_v11 = vpop.f32.mrf.mxu1 }
 0x11d   : > { %445 = vst [vmem:[%s933_s29 + $0x58] sm:$0xff] %v420_v8  ;;  %v433_v12 = vmax.f32 %v406_v9, 0.0  ;;  %v346_v13 = vadd.f32 %v925_v42, %v345_v10 }
 0x11e   : > { %v635_v14 = vpop.f32.mrf.mxu0 }
 0x11f   : > { %458 = vst [vmem:[%s933_s29 + $0xc0] sm:$0xf] %v433_v12  ;;  %v421_v15 = vmax.f32 %v346_v13, 0.0 }
 0x121   : > { %446 = vst [vmem:[%s933_s29 + $0x60] sm:$0xff] %v421_v15 }
 0x122 PF: > { %s13_s12 = sadd.s32 1, %s721_s12  }
 0x123   : > { %p10_p4 = scmp.ge.s32.totalorder %s13_s12, 4  }
 0x125   :  { %12 = sbr.rel (!%p10_p4) target bundleno = 1 (0x1), region = 62 }

</bundles_post_ra>
